<compile_context>
chip_gen: v5e
topology: v5e:2x2
jax: 0.10.0
libtpu: 0.0.40
codegen_flags: <defaults>
</compile_context>

<pallas_src>
import functools

import jax
import jax.numpy as jnp
from jax import lax
from jax.experimental import pallas as pl
from jax.experimental.pallas import tpu as pltpu


def _ce_target0_single_block_kernel(x_ref, o_ref, *, n_rows, tile_rows):
    """Whole class axis resident in one block: plain (non-streaming) LSE."""
    i = pl.program_id(0)                                      # row-tile index
    x = x_ref[...].astype(jnp.float32)                        # (TN, C), f32 math
    m = jnp.max(x, axis=-1, keepdims=True)                    # (TN, 1)
    s = jnp.sum(jnp.exp(x - m), axis=-1, keepdims=True)       # (TN, 1)
    per_row = m + jnp.log(s) - x[:, 0:1]                      # CE vs class 0
    if n_rows % tile_rows != 0:
        row_ids = i * tile_rows + lax.broadcasted_iota(jnp.int32, per_row.shape, 0)
        per_row = jnp.where(row_ids < n_rows, per_row, 0.0)
    o_ref[...] = per_row


def _ce_target0_streaming_kernel(x_ref, o_ref, m_sc, s_sc, x0_sc, *,
                                 n_rows, n_cols, tile_rows, tile_cols):
    """Large C: online log-sum-exp streamed over the class axis."""
    i = pl.program_id(0)          # row-tile index   ("parallel")
    j = pl.program_id(1)          # class-tile index ("arbitrary", innermost)

    x = x_ref[...].astype(jnp.float32)                        # (TN, TC)

    # Mask padded class lanes of a partial last column block.
    if n_cols % tile_cols != 0:
        col_ids = j * tile_cols + lax.broadcasted_iota(jnp.int32, x.shape, 1)
        x = jnp.where(col_ids < n_cols, x, -1e30)

    @pl.when(j == 0)
    def _init():
        m_sc[...] = jnp.full((tile_rows, 1), -jnp.inf, dtype=jnp.float32)
        s_sc[...] = jnp.zeros((tile_rows, 1), dtype=jnp.float32)
        x0_sc[...] = x[:, 0:1]                                # positive logit (class 0)

    # Streaming (online) log-sum-exp over the class axis.
    m_prev = m_sc[...]                                        # (TN, 1)
    m_new = jnp.maximum(m_prev, jnp.max(x, axis=-1, keepdims=True))
    alpha = jnp.exp(m_prev - m_new)
    s_sc[...] = alpha * s_sc[...] + jnp.sum(jnp.exp(x - m_new), axis=-1, keepdims=True)
    m_sc[...] = m_new

    @pl.when(j == pl.num_programs(1) - 1)
    def _finalize():
        per_row = m_sc[...] + jnp.log(s_sc[...]) - x0_sc[...]  # (TN, 1)
        if n_rows % tile_rows != 0:
            row_ids = i * tile_rows + lax.broadcasted_iota(jnp.int32, per_row.shape, 0)
            per_row = jnp.where(row_ids < n_rows, per_row, 0.0)
        o_ref[...] = per_row


_BLOCK_BUDGET = 8 * 1024 * 1024          # bytes per (double-buffered) input block
_VMEM_LIMIT = 32 * 1024 * 1024           # safe on v5e/v6e/v7x


def _pick_tile_rows(n_rows, tile_cols, itemsize, sublane):
    tile_rows = max(sublane,
                    (_BLOCK_BUDGET // (tile_cols * itemsize)) // sublane * sublane)
    tile_rows = min(tile_rows, 2048)
    if tile_rows >= n_rows:
        tile_rows = n_rows                                    # full dim is always legal
    return tile_rows


def contrastive_loss(inputs: jax.Array, reduction: str = "mean", *,
                     tile_rows: int | None = None,
                     tile_cols: int | None = None) -> jax.Array:
    """inputs: (N, C) float logits (f32 or bf16). CrossEntropy vs class-0 targets."""
    assert inputs.ndim == 2, "expected (batch, num_classes) logits"
    n_rows, n_cols = inputs.shape
    itemsize = jnp.dtype(inputs.dtype).itemsize
    sublane = {4: 8, 2: 16, 1: 32}.get(itemsize, 8)

    # Single-pass when the whole class axis fits comfortably in one block.
    single_pass = (tile_cols is None and n_cols * itemsize <= 64 * 1024) or \
                  (tile_cols is not None and tile_cols >= n_cols)

    if single_pass:
        tile_cols = n_cols
        if tile_rows is None:
            tile_rows = _pick_tile_rows(n_rows, tile_cols, itemsize, sublane)
        grid_rows = pl.cdiv(n_rows, tile_rows)
        padded_rows = grid_rows * tile_rows
        kernel = functools.partial(_ce_target0_single_block_kernel,
                                   n_rows=n_rows, tile_rows=tile_rows)
        grid_spec = pltpu.PrefetchScalarGridSpec(
            num_scalar_prefetch=0,
            grid=(grid_rows,),
            in_specs=[pl.BlockSpec((tile_rows, n_cols), lambda i: (i, 0))],
            out_specs=pl.BlockSpec((tile_rows, 1), lambda i: (i, 0)),
        )
        dim_sem = ("parallel",)
    else:
        if tile_cols is None:
            tile_cols = 2048
        if tile_rows is None:
            tile_rows = _pick_tile_rows(n_rows, tile_cols, itemsize, sublane)
        grid_rows = pl.cdiv(n_rows, tile_rows)
        grid_cols = pl.cdiv(n_cols, tile_cols)
        padded_rows = grid_rows * tile_rows
        kernel = functools.partial(_ce_target0_streaming_kernel,
                                   n_rows=n_rows, n_cols=n_cols,
                                   tile_rows=tile_rows, tile_cols=tile_cols)
        grid_spec = pltpu.PrefetchScalarGridSpec(
            num_scalar_prefetch=0,
            grid=(grid_rows, grid_cols),
            in_specs=[pl.BlockSpec((tile_rows, tile_cols), lambda i, j: (i, j))],
            out_specs=pl.BlockSpec((tile_rows, 1), lambda i, j: (i, 0)),
            scratch_shapes=[pltpu.VMEM((tile_rows, 1), jnp.float32),   # running max
                            pltpu.VMEM((tile_rows, 1), jnp.float32),   # running sum(exp)
                            pltpu.VMEM((tile_rows, 1), jnp.float32)],  # positive logit
        )
        dim_sem = ("parallel", "arbitrary")

    cost = pl.CostEstimate(
        flops=6 * n_rows * n_cols,
        transcendentals=n_rows * n_cols + 2 * n_rows,
        bytes_accessed=n_rows * n_cols * itemsize + padded_rows * 4,
    )

    per_row = pl.pallas_call(
        kernel,
        out_shape=jax.ShapeDtypeStruct((padded_rows, 1), jnp.float32),
        grid_spec=grid_spec,
        compiler_params=pltpu.CompilerParams(
            dimension_semantics=dim_sem,
            vmem_limit_bytes=_VMEM_LIMIT,
        ),
        cost_estimate=cost,
    )(inputs)

    losses = per_row[:n_rows, 0]
    if reduction == "mean":
        return jnp.sum(losses) / n_rows
    if reduction == "sum":
        return jnp.sum(losses)
    if reduction == "none":
        return losses
    raise ValueError(f"unsupported reduction: {reduction}")


if __name__ == "__main__":
    key = jax.random.PRNGKey(0)
    k1, k2, k3 = jax.random.split(key, 3)

    # 1) Small example matching the module: 8 queries, 1 positive + 31 negatives.
    #    Exercises the single-pass kernel with a single full row tile.
    N, C = 8, 32
    logits = jax.random.normal(k1, (N, C), dtype=jnp.float32)
    loss = contrastive_loss(logits)
    jax.block_until_ready(loss)
    ref = jnp.mean(jax.nn.logsumexp(logits, axis=-1) - logits[:, 0])
    assert jnp.allclose(loss, ref, atol=1e-5, rtol=1e-5), (loss, ref)

    # 2) Single-pass kernel with a partial last row tile (row mask path).
    N1, C1 = 130, 96
    logits1 = jax.random.normal(k3, (N1, C1), dtype=jnp.float32)
    loss1 = contrastive_loss(logits1, reduction="sum", tile_rows=64)
    jax.block_until_ready(loss1)
    ref1 = jnp.sum(jax.nn.logsumexp(logits1, axis=-1) - logits1[:, 0])
    assert jnp.allclose(loss1, ref1, atol=1e-4, rtol=1e-5), (loss1, ref1)

    # 3) bf16 input + forced small tiles: exercises the streaming-LSE kernel,
    #    the 2-D grid, and both row/column padding masks on partial edge tiles.
    N2, C2 = 200, 160
    logits2 = jax.random.normal(k2, (N2, C2), dtype=jnp.float32).astype(jnp.bfloat16)
    loss2 = contrastive_loss(logits2, tile_rows=64, tile_cols=128)
    jax.block_until_ready(loss2)
    x32 = logits2.astype(jnp.float32)
    ref2 = jnp.mean(jax.nn.logsumexp(x32, axis=-1) - x32[:, 0])
    assert jnp.allclose(loss2, ref2, atol=1e-3, rtol=1e-3), (loss2, ref2)

    print("KERNEL_OK")
</pallas_src>

<mosaic_0001>
module attributes {stable_mosaic.version = 11 : i64} {
  func.func @_ce_target0_single_block_kernel(%arg0: i32, %arg1: memref<8x32xf32, #tpu.memory_space<vmem>>, %arg2: memref<8x1xf32, #tpu.memory_space<vmem>>) attributes {dimension_semantics = [#tpu.dimension_semantics<parallel>], iteration_bounds = array<i64: 1>, scalar_prefetch = 0 : i64, scratch_operands = 0 : i64, tpu.core_type = #tpu.core_type<tc>, window_params = [{transform_indices = @transform_0, window_bounds = array<i64: 8, 32>}, {transform_indices = @transform_1, window_bounds = array<i64: 8, 1>}]} {
    %c0 = arith.constant 0 : index
    %c0_0 = arith.constant 0 : index
    %0 = vector.load %arg1[%c0, %c0_0] : memref<8x32xf32, #tpu.memory_space<vmem>>, vector<8x32xf32>
    %cst = arith.constant dense<0xFF800000> : vector<8xf32>
    %1 = vector.multi_reduction <maximumf>, %0, %cst [1] : vector<8x32xf32> to vector<8xf32>
    %2 = vector.shape_cast %1 : vector<8xf32> to vector<8x1xf32>
    %3 = vector.broadcast %2 : vector<8x1xf32> to vector<8x32xf32>
    %4 = arith.subf %0, %3 : vector<8x32xf32>
    %5 = math.exp %4 : vector<8x32xf32>
    %cst_1 = arith.constant dense<0.000000e+00> : vector<8xf32>
    %6 = vector.multi_reduction <add>, %5, %cst_1 [1] : vector<8x32xf32> to vector<8xf32>
    %7 = vector.shape_cast %6 : vector<8xf32> to vector<8x1xf32>
    %8 = math.log %7 : vector<8x1xf32>
    %9 = arith.addf %2, %8 : vector<8x1xf32>
    %10 = vector.extract_strided_slice %0 {offsets = [0, 0], sizes = [8, 1], strides = [1, 1]} : vector<8x32xf32> to vector<8x1xf32>
    %11 = arith.subf %9, %10 : vector<8x1xf32>
    %c0_2 = arith.constant 0 : index
    %c0_3 = arith.constant 0 : index
    %12 = vector.load %arg2[%c0_2, %c0_3] : memref<8x1xf32, #tpu.memory_space<vmem>>, vector<8x1xf32>
    tpu.vector_store %arg2[%c0_2, %c0_3], %11 {strides = array<i32>} : memref<8x1xf32, #tpu.memory_space<vmem>>, vector<8x1xf32>,
    return
  }
  func.func @transform_0(%arg0: i32) -> (i32, i32) {
    %c0_i32 = arith.constant 0 : i32
    %c0_i32_0 = arith.constant 0 : i32
    return %arg0, %c0_i32 : i32, i32
  }
  func.func @transform_1(%arg0: i32) -> (i32, i32) {
    %c0_i32 = arith.constant 0 : i32
    %c0_i32_0 = arith.constant 0 : i32
    return %arg0, %c0_i32 : i32, i32
  }
}

</mosaic_0001>

<bundles_post_ra>
// kernel: tpu_custom_call.1
= control target key start
LH: loop header
LB: loop body
LE: loop exit
PB: predicated region body
PF: predicated region fallthrough
CT: control target
= control target key end

     0   :  { %6 = vsyncpa [#allocation3], 0  ;;  %s75_s9 = smov [#allocation2]   ;;  %s92_s0 = inlined_call_operand.hbm [shape: f32[8,32], index: 0, kind: input, shape index: {}]   ;;  %s93_s1 = inlined_call_operand.vmem [shape: f32[8,1], index: 1, kind: output, shape index: {}]  }
   0x1   :  { %s12_s8 = sshll.u32 %s92_s0, 4  ;;  %s14_s10 = sshll.u32 %s75_s9, 4  ;;  %s13_s8 = int_to_ptr.hbm [resolvable:$true] %s12_s8  ;;  %s15_s10 = int_to_ptr.vmem [resolvable:$true] %s14_s10 }
   0x2   :  { %17 = dma.hbm_to_vmem [thread:$0]  %s13_s8, 128, %s15_s10, [#allocation3]  }
   0x3   :  { %73 = dma.done.wait [#allocation3], 128  }
   0x4   :  { %74 = vsyncadd [#allocation3], 4294967168  ;;  %vm23_vm0 = vcmask 261120   ;;  %v22_v0 = vld [vmem:[#allocation2] sm:$0xff]  ;;  %vm37_vm1 = vcmask 7168  }
   0x5   :  { %v24_v1 = vsel %vm23_vm0, %v22_v0, -inf }
   0x6   :  { %25 = vmax.xlane.f32.xlu0 %v24_v1 }
  0x79   :  { %v26_v2 = vpop.xlane.xlu0 %25 }
  0x7a   :  { %v27_v3 = vsub.f32 %v22_v0, %v26_v2 }
  0x7c   :  { %v28_v4 = vmul.f32 1.442695, %v27_v3 }
  0x7e   :  { %45 = vpow2.f32 %v28_v4 }
  0x84   :  { %v46_v5 = vpop.eup %45 }
  0x85   :  { %v30_v6 = vsel %vm23_vm0, %v46_v5, 0.0 }
  0x86   :  { %31 = vadd.xlane.f32.xlu0 %v30_v6 }
  0xf9   :  { %v32_v7 = vpop.xlane.xlu0 %31 }
  0xfa   :  { %47 = vlog2.f32 %v32_v7 }
 0x100   :  { %v48_v8 = vpop.eup %47 }
 0x101   :  { %v34_v9 = vmul.f32 0.6931472, %v48_v8 }
 0x103   :  { %v35_v10 = vadd.f32 %v34_v9, %v26_v2 }
 0x105   :  { %v36_v11 = vsub.f32 %v35_v10, %v22_v0 }
 0x107   :  { %38 = vst.msk [vmem:[%s93_s1] sm:$0xff] %vm37_vm1, %v36_v11 }
 0x108   :  { %43 = vsyncpa [#allocation3], 1 }

</bundles_post_ra>
